<compile_context>
chip_gen: v6e
topology: v6e:2x2x1
jax: 0.10.0
libtpu: 0.0.40
codegen_flags: <defaults>
</compile_context>

<pallas_src>
import functools

import jax
import jax.numpy as jnp
import numpy as np
from jax.experimental import pallas as pl
from jax.experimental.pallas import tpu as pltpu

BN_EPS = 1e-5


# ----------------------------------------------------------------------------
# Banded conv weights: a stride-1 'same' 3x3 conv on a lane-dense (rows, W*Cin)
# activation becomes     out[r] = sum_ky  x_rows[r + ky - 1] @ B[ky]
# with B[ky] a (W*Cin, W*Cout) block-banded matrix.  Taps that fall outside the
# image width are simply omitted from B, which is exactly zero 'same' padding.
# TODO(synk): B scales as O(W^2 * Cin * Cout); for large W tile the W axis (or
# fall back to an in-kernel im2col formulation).
# ----------------------------------------------------------------------------
def _banded_conv_weight(w_oihw, width):
    cout, cin, kh, kw = w_oihw.shape
    assert (kh, kw) == (3, 3), w_oihw.shape
    w_hwio = jnp.transpose(w_oihw, (2, 3, 1, 0)).astype(jnp.float32)   # (3,3,cin,cout)
    ai = jnp.arange(width)[None, :, None]          # input column block
    ao = jnp.arange(width)[None, None, :]          # output column block
    kx = jnp.arange(3)[:, None, None]
    mask = (ai == ao + kx - 1).astype(jnp.float32)                     # (3, W, W)
    b = jnp.einsum("kio,ykcd->yicod", mask, w_hwio)                    # (3, W, cin, W, cout)
    return b.reshape(3, width * cin, width * cout).astype(jnp.bfloat16)


# ----------------------------------------------------------------------------
# Fused Differential_block kernel (one row-band of one image per grid step)
# ----------------------------------------------------------------------------
def _diff_block_kernel(xtop_ref, xmid_ref, xbot_ref,
                       b1_ref, bb_ref, b2_ref, sb1_ref, sb2_ref,
                       out_ref, xbuf_ref, ybuf_ref, zbuf_ref,
                       *, th, h_img):
    r0 = pl.program_id(1) * th                     # first output image row of this tile

    # x row window: image rows [r0-3, r0+th+3), assembled from the 8-row halo streams.
    # The unused halo rows are either real neighbouring rows or genuine zero pad rows,
    # so no boundary masking of the DMA'd data is needed.
    xbuf_ref[0:3, :] = xtop_ref[0, 5:8, :]
    xbuf_ref[3:3 + th, :] = xmid_ref[0]
    xbuf_ref[3 + th:6 + th, :] = xbot_ref[0, 0:3, :]

    # ---- stage 1: conv1 + BN1 + SiLU -> y, image rows [r0-2, r0+th+2) -----------------
    n1 = th + 4
    acc = jnp.zeros((n1, ybuf_ref.shape[1]), jnp.float32)
    for ky in range(3):
        acc = acc + jnp.dot(xbuf_ref[ky:ky + n1, :], b1_ref[ky],
                            preferred_element_type=jnp.float32)
    y = acc * sb1_ref[0:1, :] + sb1_ref[1:2, :]    # folded BatchNorm (eval semantics)
    y = y * jax.nn.sigmoid(y)                      # SiLU (f32 epilogue, v5e-safe)
    row = jax.lax.broadcasted_iota(jnp.int32, (n1, 1), 0) + (r0 - 2)
    y = jnp.where((row >= 0) & (row < h_img), y, 0.0)   # rows outside the image are zero pad
    ybuf_ref[...] = y.astype(ybuf_ref.dtype)

    # ---- stage 2: BayarConv2d (no BN / act) -> z, image rows [r0-1, r0+th+1) ----------
    n2 = th + 2
    acc = jnp.zeros((n2, zbuf_ref.shape[1]), jnp.float32)
    for ky in range(3):
        acc = acc + jnp.dot(ybuf_ref[ky:ky + n2, :], bb_ref[ky],
                            preferred_element_type=jnp.float32)
    row = jax.lax.broadcasted_iota(jnp.int32, (n2, 1), 0) + (r0 - 1)
    z = jnp.where((row >= 0) & (row < h_img), acc, 0.0)
    zbuf_ref[...] = z.astype(zbuf_ref.dtype)

    # ---- stage 3: conv2 + BN2 + SiLU + identity -> out, image rows [r0, r0+th) --------
    acc = jnp.zeros((th, out_ref.shape[2]), jnp.float32)
    for ky in range(3):
        acc = acc + jnp.dot(zbuf_ref[ky:ky + th, :], b2_ref[ky],
                            preferred_element_type=jnp.float32)
    o = acc * sb2_ref[0:1, :] + sb2_ref[1:2, :]
    o = o * jax.nn.sigmoid(o)
    o = o + ybuf_ref[2:2 + th, :].astype(jnp.float32)    # residual = y rows [r0, r0+th)
    out_ref[0] = o.astype(out_ref.dtype)                 # lane-dense (th, W*Cout) store


# ----------------------------------------------------------------------------
# Tiling / VMEM heuristics
# ----------------------------------------------------------------------------
def _vmem_capacity_bytes():
    try:
        return int(pltpu.get_tpu_info().vmem_capacity_bytes)
    except Exception:
        return 64 << 20        # v7x per-TensorCore floor


def _tile_vmem_bytes(th, lx, ly, lz, lo, weight_bytes):
    # count ALL double-buffered streams, the resident weights, scratches and f32 temps
    streams = 2 * ((th + 16) * lx * 2 + th * lo * 4)            # x (mid + 2 halos) / out
    vectors = 2 * 2 * (ly + lo) * 4                             # folded BN scale/bias
    scratch = ((th + 6) * lx + (th + 4) * ly + (th + 2) * lz) * 2
    temps = 2 * ((th + 4) * ly + (th + 2) * lz + th * lo) * 4   # f32 accumulators/epilogue
    return streams + vectors + scratch + temps + 2 * weight_bytes


def _pick_tile_rows(n_images, h, lx, ly, lz, lo, weight_bytes, budget):
    cands = [d for d in range(8, h + 1, 8) if h % d == 0] or [h]
    fits = [d for d in cands
            if _tile_vmem_bytes(d, lx, ly, lz, lo, weight_bytes) <= budget] or [cands[0]]
    # keep >= 4 parallel grid steps when possible (v7x: 2 TCs sharded over parallel axes),
    # otherwise take the largest tile that fits (amortizes the ~0.35us/step overhead).
    par = [d for d in fits if n_images * (h // d) >= 4]
    return max(par) if par else max(fits)


# ----------------------------------------------------------------------------
# BayarConv2d constraint (faithful to the PyTorch code, incl. the raw row-major
# reshape that mixes the channel axes)
# ----------------------------------------------------------------------------
def bayar_real_kernel(kernel_param):
    # kernel_param: (C_in_bayar, C_out_bayar, 8); C_in_bayar = block out_channels,
    # C_out_bayar = mid.  Division is faithful to the module (no epsilon guard).
    cin_b, cout_b, _ = kernel_param.shape
    k = kernel_param / kernel_param.sum(axis=2, keepdims=True)      # each 8-vector sums to 1
    minus1 = -jnp.ones((cin_b, cout_b, 1), k.dtype)
    ctr = 9 // 2
    real = jnp.concatenate([k[:, :, :ctr], minus1, k[:, :, ctr:]], axis=2)   # (cin_b, cout_b, 9)
    # exact semantics of torch .reshape((out_channels, in_channels, 3, 3)) on contiguous memory
    return real.reshape(cout_b, cin_b, 3, 3)                                  # OIHW


# ----------------------------------------------------------------------------
# Differential_block forward (single fused Pallas call)
# ----------------------------------------------------------------------------
def differential_block_forward(x_nchw, params):
    n, cin, h, w = x_nchw.shape
    c1 = params["conv1_w"].shape[0]
    cm = params["conv2_w"].shape[1]
    assert h % 8 == 0, "TODO(synk): masked remainder tile for H % 8 != 0"

    # folded BatchNorm (inference semantics)
    s1 = params["bn1_gamma"] * jax.lax.rsqrt(params["bn1_var"] + BN_EPS)
    b1 = params["bn1_beta"] - params["bn1_mean"] * s1
    s2 = params["bn2_gamma"] * jax.lax.rsqrt(params["bn2_var"] + BN_EPS)
    b2 = params["bn2_beta"] - params["bn2_mean"] * s2

    bw1 = _banded_conv_weight(params["conv1_w"], w)                          # (3, W*Cin, W*C1)
    bwb = _banded_conv_weight(bayar_real_kernel(params["bayar_kernel"]), w)  # (3, W*C1, W*Cm)
    bw2 = _banded_conv_weight(params["conv2_w"], w)                          # (3, W*Cm, W*C1)
    sb1 = jnp.stack([jnp.tile(s1, w), jnp.tile(b1, w)]).astype(jnp.float32)  # (2, W*C1)
    sb2 = jnp.stack([jnp.tile(s2, w), jnp.tile(b2, w)]).astype(jnp.float32)

    lx, ly, lz, lo = w * cin, w * c1, w * cm, w * c1
    weight_bytes = 2 * (bw1.size + bwb.size + bw2.size)
    budget = min(_vmem_capacity_bytes() // 2, 40 << 20)          # derated for v7x (64 MiB/TC)
    th = _pick_tile_rows(n, h, lx, ly, lz, lo, weight_bytes, budget)
    nrt = h // th
    t8 = th // 8

    # Lane-dense activation layout (N, rows, W*Cin), bf16 transfers.  H is padded once by
    # (th, 8) zero rows so every halo row-block below is in bounds and genuinely zero.
    # TODO(synk): keeping the surrounding model in NHWC would drop this transpose and the
    # one on the output (NCHW is what the PyTorch module exposes).
    x_lane = jnp.transpose(x_nchw, (0, 2, 3, 1)).reshape(n, h, lx).astype(jnp.bfloat16)
    x_pad = jnp.pad(x_lane, ((0, 0), (th, 8), (0, 0)))

    kernel = functools.partial(_diff_block_kernel, th=th, h_img=h)

    in_specs = [
        pl.BlockSpec((1, 8, lx), lambda i, j: (i, (j + 1) * t8 - 1, 0)),   # 8 rows above tile
        pl.BlockSpec((1, th, lx), lambda i, j: (i, j + 1, 0)),             # tile body rows
        pl.BlockSpec((1, 8, lx), lambda i, j: (i, (j + 2) * t8, 0)),       # 8 rows below tile
        pl.BlockSpec((3, lx, ly), lambda i, j: (0, 0, 0)),                 # resident banded weights
        pl.BlockSpec((3, ly, lz), lambda i, j: (0, 0, 0)),
        pl.BlockSpec((3, lz, lo), lambda i, j: (0, 0, 0)),
        pl.BlockSpec((2, ly), lambda i, j: (0, 0)),                        # folded BN1 scale/bias
        pl.BlockSpec((2, lo), lambda i, j: (0, 0)),                        # folded BN2 scale/bias
    ]
    out_specs = pl.BlockSpec((1, th, lo), lambda i, j: (i, j, 0))
    scratch_shapes = [pltpu.VMEM((th + 6, lx), jnp.bfloat16),   # x row window
                      pltpu.VMEM((th + 4, ly), jnp.bfloat16),   # y (also the residual)
                      pltpu.VMEM((th + 2, lz), jnp.bfloat16)]   # z (Bayar intermediate)

    vmem_need = _tile_vmem_bytes(th, lx, ly, lz, lo, weight_bytes)
    vmem_limit = int(min(max(2 * vmem_need, 8 << 20), budget))

    rows1, rows2 = h + 4 * nrt, h + 2 * nrt
    cost = pl.CostEstimate(
        flops=int(2 * 3 * n * (rows1 * lx * ly + rows2 * ly * lz + h * lz * lo)),
        transcendentals=int(n * (rows1 * ly + h * lo)),
        bytes_accessed=int(x_pad.size * 2 + n * nrt * 16 * lx * 2 + weight_bytes
                           + (sb1.size + sb2.size) * 4 + n * h * lo * 4))

    out = pl.pallas_call(
        kernel,
        out_shape=jax.ShapeDtypeStruct((n, h, lo), jnp.float32),
        grid=(n, nrt),
        in_specs=in_specs,
        out_specs=out_specs,
        scratch_shapes=scratch_shapes,
        compiler_params=pltpu.CompilerParams(
            dimension_semantics=("parallel", "parallel"),
            vmem_limit_bytes=vmem_limit),
        cost_estimate=cost,
    )(x_pad, x_pad, x_pad, bw1, bwb, bw2, sb1, sb2)

    return jnp.transpose(out.reshape(n, h, w, c1), (0, 3, 1, 2))            # back to NCHW


# ----------------------------------------------------------------------------
# Pure-JAX reference (lax.conv, f32) for correctness checking
# ----------------------------------------------------------------------------
def differential_block_reference(x_nchw, params):
    def conv(x, wgt):
        return jax.lax.conv_general_dilated(
            x, wgt, window_strides=(1, 1), padding=[(1, 1), (1, 1)],
            dimension_numbers=("NCHW", "OIHW", "NCHW"))

    def bn(x, g, b, m, v):
        g = g[None, :, None, None]; b = b[None, :, None, None]
        m = m[None, :, None, None]; v = v[None, :, None, None]
        return (x - m) / jnp.sqrt(v + BN_EPS) * g + b

    silu = lambda t: t * jax.nn.sigmoid(t)

    y = silu(bn(conv(x_nchw, params["conv1_w"]),
                params["bn1_gamma"], params["bn1_beta"], params["bn1_mean"], params["bn1_var"]))
    ident = y
    z = conv(y, bayar_real_kernel(params["bayar_kernel"]))
    out = silu(bn(conv(z, params["conv2_w"]),
                  params["bn2_gamma"], params["bn2_beta"], params["bn2_mean"], params["bn2_var"]))
    return ident + out


# ----------------------------------------------------------------------------
# Deterministic synthetic parameters (shapes from Differential_block.__init__)
# ----------------------------------------------------------------------------
def make_params(key, in_channels, out_channels, e=2):
    mid = out_channels // e
    keys = jax.random.split(key, 12)
    u = lambda k, shape, lo, hi: jax.random.uniform(k, shape, jnp.float32, lo, hi)
    return {
        "conv1_w": u(keys[0], (out_channels, in_channels, 3, 3), -0.3, 0.3),
        "bn1_gamma": u(keys[1], (out_channels,), 0.5, 1.5),
        "bn1_beta": u(keys[2], (out_channels,), -0.2, 0.2),
        "bn1_mean": u(keys[3], (out_channels,), -0.2, 0.2),
        "bn1_var": u(keys[4], (out_channels,), 0.5, 1.5),
        # BayarConv2d(out_channels, mid): nn.Parameter(torch.rand(in, out, k*k-1))
        "bayar_kernel": u(keys[5], (out_channels, mid, 8), 0.0, 1.0),
        "conv2_w": u(keys[6], (out_channels, mid, 3, 3), -0.3, 0.3),
        "bn2_gamma": u(keys[7], (out_channels,), 0.5, 1.5),
        "bn2_beta": u(keys[8], (out_channels,), -0.2, 0.2),
        "bn2_mean": u(keys[9], (out_channels,), -0.2, 0.2),
        "bn2_var": u(keys[10], (out_channels,), 0.5, 1.5),
    }


if __name__ == "__main__":
    key = jax.random.PRNGKey(0)
    kx_, kp = jax.random.split(key)

    N, C_in, H, W = 2, 4, 16, 16
    C_out = 8  # mid = 4
    x = jax.random.normal(kx_, (N, C_in, H, W), jnp.float32)   # NCHW like the PyTorch module
    params = make_params(kp, C_in, C_out, e=2)

    fwd = jax.jit(differential_block_forward)
    out = jax.block_until_ready(fwd(x, params))
    ref = jax.block_until_ready(differential_block_reference(x, params))

    assert out.shape == (N, C_out, H, W), out.shape
    # bf16 activations/weights inside the kernel -> bf16-appropriate tolerance vs f32 reference
    np.testing.assert_allclose(np.asarray(out), np.asarray(ref), rtol=4e-2, atol=4e-2)

    print("KERNEL_OK")
</pallas_src>

<mosaic_0001>
module attributes {stable_mosaic.version = 11 : i64} {
  func.func @_diff_block_kernel(%arg0: i32, %arg1: i32, %arg2: memref<1x8x64xbf16, #tpu.memory_space<vmem>>, %arg3: memref<1x8x64xbf16, #tpu.memory_space<vmem>>, %arg4: memref<1x8x64xbf16, #tpu.memory_space<vmem>>, %arg5: memref<3x64x128xbf16, #tpu.memory_space<vmem>>, %arg6: memref<3x128x64xbf16, #tpu.memory_space<vmem>>, %arg7: memref<3x64x128xbf16, #tpu.memory_space<vmem>>, %arg8: memref<2x128xf32, #tpu.memory_space<vmem>>, %arg9: memref<2x128xf32, #tpu.memory_space<vmem>>, %arg10: memref<1x8x128xf32, #tpu.memory_space<vmem>>, %arg11: memref<14x64xbf16, #tpu.memory_space<vmem>>, %arg12: memref<12x128xbf16, #tpu.memory_space<vmem>>, %arg13: memref<10x64xbf16, #tpu.memory_space<vmem>>) attributes {dimension_semantics = [#tpu.dimension_semantics<parallel>, #tpu.dimension_semantics<parallel>], iteration_bounds = array<i64: 2, 2>, scalar_prefetch = 0 : i64, scratch_operands = 3 : i64, tpu.core_type = #tpu.core_type<tc>, window_params = [{transform_indices = @transform_0, window_bounds = array<i64: 1, 8, 64>}, {transform_indices = @transform_1, window_bounds = array<i64: 1, 8, 64>}, {transform_indices = @transform_2, window_bounds = array<i64: 1, 8, 64>}, {pipeline_mode = #tpu.pipeline_mode<synchronous>, transform_indices = @transform_3, window_bounds = array<i64: 3, 64, 128>}, {pipeline_mode = #tpu.pipeline_mode<synchronous>, transform_indices = @transform_4, window_bounds = array<i64: 3, 128, 64>}, {pipeline_mode = #tpu.pipeline_mode<synchronous>, transform_indices = @transform_5, window_bounds = array<i64: 3, 64, 128>}, {pipeline_mode = #tpu.pipeline_mode<synchronous>, transform_indices = @transform_6, window_bounds = array<i64: 2, 128>}, {pipeline_mode = #tpu.pipeline_mode<synchronous>, transform_indices = @transform_7, window_bounds = array<i64: 2, 128>}, {transform_indices = @transform_8, window_bounds = array<i64: 1, 8, 128>}]} {
    %c8_i32 = arith.constant 8 : i32
    %0 = arith.muli %arg1, %c8_i32 : i32
    %c0 = arith.constant 0 : index
    %c5 = arith.constant 5 : index
    %c0_0 = arith.constant 0 : index
    %1 = vector.load %arg2[%c0, %c5, %c0_0] : memref<1x8x64xbf16, #tpu.memory_space<vmem>>, vector<1x3x64xbf16>
    %2 = vector.shape_cast %1 : vector<1x3x64xbf16> to vector<3x64xbf16>
    %c0_1 = arith.constant 0 : index
    %c0_2 = arith.constant 0 : index
    %3 = vector.load %arg11[%c0_1, %c0_2] : memref<14x64xbf16, #tpu.memory_space<vmem>>, vector<3x64xbf16>
    tpu.vector_store %arg11[%c0_1, %c0_2], %2 {strides = array<i32>} : memref<14x64xbf16, #tpu.memory_space<vmem>>, vector<3x64xbf16>,
    %c0_3 = arith.constant 0 : index
    %c0_4 = arith.constant 0 : index
    %c0_5 = arith.constant 0 : index
    %4 = vector.load %arg3[%c0_3, %c0_4, %c0_5] : memref<1x8x64xbf16, #tpu.memory_space<vmem>>, vector<1x8x64xbf16>
    %5 = vector.shape_cast %4 : vector<1x8x64xbf16> to vector<8x64xbf16>
    %c3 = arith.constant 3 : index
    %c0_6 = arith.constant 0 : index
    %6 = vector.load %arg11[%c3, %c0_6] : memref<14x64xbf16, #tpu.memory_space<vmem>>, vector<8x64xbf16>
    tpu.vector_store %arg11[%c3, %c0_6], %5 {strides = array<i32>} : memref<14x64xbf16, #tpu.memory_space<vmem>>, vector<8x64xbf16>,
    %c0_7 = arith.constant 0 : index
    %c0_8 = arith.constant 0 : index
    %c0_9 = arith.constant 0 : index
    %7 = vector.load %arg4[%c0_7, %c0_8, %c0_9] : memref<1x8x64xbf16, #tpu.memory_space<vmem>>, vector<1x3x64xbf16>
    %8 = vector.shape_cast %7 : vector<1x3x64xbf16> to vector<3x64xbf16>
    %c11 = arith.constant 11 : index
    %c0_10 = arith.constant 0 : index
    %9 = vector.load %arg11[%c11, %c0_10] : memref<14x64xbf16, #tpu.memory_space<vmem>>, vector<3x64xbf16>
    tpu.vector_store %arg11[%c11, %c0_10], %8 {strides = array<i32>} : memref<14x64xbf16, #tpu.memory_space<vmem>>, vector<3x64xbf16>,
    %cst = arith.constant 0.000000e+00 : f32
    %10 = vector.broadcast %cst : f32 to vector<12x128xf32>
    %c0_11 = arith.constant 0 : index
    %c0_12 = arith.constant 0 : index
    %11 = vector.load %arg11[%c0_11, %c0_12] : memref<14x64xbf16, #tpu.memory_space<vmem>>, vector<12x64xbf16>
    %c0_13 = arith.constant 0 : index
    %c0_14 = arith.constant 0 : index
    %c0_15 = arith.constant 0 : index
    %12 = vector.load %arg5[%c0_13, %c0_14, %c0_15] : memref<3x64x128xbf16, #tpu.memory_space<vmem>>, vector<1x64x128xbf16>
    %13 = vector.shape_cast %12 : vector<1x64x128xbf16> to vector<64x128xbf16>
    %cst_16 = arith.constant dense<0.000000e+00> : vector<12x128xf32>
    %14 = tpu.matmul %11, %13, %cst_16 {dimension_numbers = #tpu.dot_dimension_numbers<[1], [0], [0], [1], [0, 0, 1, 1], [], []>} : vector<12x64xbf16>, vector<64x128xbf16>, vector<12x128xf32> -> vector<12x128xf32>
    %15 = arith.addf %10, %14 : vector<12x128xf32>
    %c1 = arith.constant 1 : index
    %c0_17 = arith.constant 0 : index
    %16 = vector.load %arg11[%c1, %c0_17] : memref<14x64xbf16, #tpu.memory_space<vmem>>, vector<12x64xbf16>
    %c1_18 = arith.constant 1 : index
    %c0_19 = arith.constant 0 : index
    %c0_20 = arith.constant 0 : index
    %17 = vector.load %arg5[%c1_18, %c0_19, %c0_20] : memref<3x64x128xbf16, #tpu.memory_space<vmem>>, vector<1x64x128xbf16>
    %18 = vector.shape_cast %17 : vector<1x64x128xbf16> to vector<64x128xbf16>
    %cst_21 = arith.constant dense<0.000000e+00> : vector<12x128xf32>
    %19 = tpu.matmul %16, %18, %cst_21 {dimension_numbers = #tpu.dot_dimension_numbers<[1], [0], [0], [1], [0, 0, 1, 1], [], []>} : vector<12x64xbf16>, vector<64x128xbf16>, vector<12x128xf32> -> vector<12x128xf32>
    %20 = arith.addf %15, %19 : vector<12x128xf32>
    %c2 = arith.constant 2 : index
    %c0_22 = arith.constant 0 : index
    %21 = vector.load %arg11[%c2, %c0_22] : memref<14x64xbf16, #tpu.memory_space<vmem>>, vector<12x64xbf16>
    %c2_23 = arith.constant 2 : index
    %c0_24 = arith.constant 0 : index
    %c0_25 = arith.constant 0 : index
    %22 = vector.load %arg5[%c2_23, %c0_24, %c0_25] : memref<3x64x128xbf16, #tpu.memory_space<vmem>>, vector<1x64x128xbf16>
    %23 = vector.shape_cast %22 : vector<1x64x128xbf16> to vector<64x128xbf16>
    %cst_26 = arith.constant dense<0.000000e+00> : vector<12x128xf32>
    %24 = tpu.matmul %21, %23, %cst_26 {dimension_numbers = #tpu.dot_dimension_numbers<[1], [0], [0], [1], [0, 0, 1, 1], [], []>} : vector<12x64xbf16>, vector<64x128xbf16>, vector<12x128xf32> -> vector<12x128xf32>
    %25 = arith.addf %20, %24 : vector<12x128xf32>
    %c0_27 = arith.constant 0 : index
    %c0_28 = arith.constant 0 : index
    %26 = vector.load %arg8[%c0_27, %c0_28] : memref<2x128xf32, #tpu.memory_space<vmem>>, vector<1x128xf32>
    %27 = vector.broadcast %26 : vector<1x128xf32> to vector<12x128xf32>
    %28 = arith.mulf %25, %27 : vector<12x128xf32>
    %c1_29 = arith.constant 1 : index
    %c0_30 = arith.constant 0 : index
    %29 = vector.load %arg8[%c1_29, %c0_30] : memref<2x128xf32, #tpu.memory_space<vmem>>, vector<1x128xf32>
    %30 = vector.broadcast %29 : vector<1x128xf32> to vector<12x128xf32>
    %31 = arith.addf %28, %30 : vector<12x128xf32>
    %32 = arith.negf %31 : vector<12x128xf32>
    %33 = math.exp %32 : vector<12x128xf32>
    %cst_31 = arith.constant 1.000000e+00 : f32
    %34 = vector.broadcast %cst_31 : f32 to vector<12x128xf32>
    %35 = arith.addf %34, %33 : vector<12x128xf32>
    %36 = arith.divf %34, %35 : vector<12x128xf32>
    %37 = arith.mulf %31, %36 : vector<12x128xf32>
    %38 = tpu.iota {dimensions = array<i32: 0>} : vector<12x1xi32>
    %c2_i32 = arith.constant 2 : i32
    %39 = arith.subi %0, %c2_i32 : i32
    %40 = vector.broadcast %39 : i32 to vector<12x1xi32>
    %41 = arith.addi %38, %40 : vector<12x1xi32>
    %c0_i32 = arith.constant 0 : i32
    %42 = vector.broadcast %c0_i32 : i32 to vector<12x1xi32>
    %43 = arith.cmpi sge, %41, %42 : vector<12x1xi32>
    %c16_i32 = arith.constant 16 : i32
    %44 = vector.broadcast %c16_i32 : i32 to vector<12x1xi32>
    %45 = arith.cmpi slt, %41, %44 : vector<12x1xi32>
    %46 = arith.andi %43, %45 : vector<12x1xi1>
    %cst_32 = arith.constant 0.000000e+00 : f32
    %47 = vector.shape_cast %46 : vector<12x1xi1> to vector<12x1xi1>
    %48 = vector.broadcast %47 : vector<12x1xi1> to vector<12x128xi1>
    %49 = vector.broadcast %cst_32 : f32 to vector<12x128xf32>
    %50 = arith.select %48, %37, %49 : vector<12x128xi1>, vector<12x128xf32>
    %51 = arith.truncf %50 : vector<12x128xf32> to vector<12x128xbf16>
    %c0_33 = arith.constant 0 : index
    %c0_34 = arith.constant 0 : index
    %52 = vector.load %arg12[%c0_33, %c0_34] : memref<12x128xbf16, #tpu.memory_space<vmem>>, vector<12x128xbf16>
    tpu.vector_store %arg12[%c0_33, %c0_34], %51 {strides = array<i32>} : memref<12x128xbf16, #tpu.memory_space<vmem>>, vector<12x128xbf16>,
    %cst_35 = arith.constant 0.000000e+00 : f32
    %53 = vector.broadcast %cst_35 : f32 to vector<10x64xf32>
    %c0_36 = arith.constant 0 : index
    %c0_37 = arith.constant 0 : index
    %54 = vector.load %arg12[%c0_36, %c0_37] : memref<12x128xbf16, #tpu.memory_space<vmem>>, vector<10x128xbf16>
    %c0_38 = arith.constant 0 : index
    %c0_39 = arith.constant 0 : index
    %c0_40 = arith.constant 0 : index
    %55 = vector.load %arg6[%c0_38, %c0_39, %c0_40] : memref<3x128x64xbf16, #tpu.memory_space<vmem>>, vector<1x128x64xbf16>
    %56 = vector.shape_cast %55 : vector<1x128x64xbf16> to vector<128x64xbf16>
    %cst_41 = arith.constant dense<0.000000e+00> : vector<10x64xf32>
    %57 = tpu.matmul %54, %56, %cst_41 {dimension_numbers = #tpu.dot_dimension_numbers<[1], [0], [0], [1], [0, 0, 1, 1], [], []>} : vector<10x128xbf16>, vector<128x64xbf16>, vector<10x64xf32> -> vector<10x64xf32>
    %58 = arith.addf %53, %57 : vector<10x64xf32>
    %c1_42 = arith.constant 1 : index
    %c0_43 = arith.constant 0 : index
    %59 = vector.load %arg12[%c1_42, %c0_43] : memref<12x128xbf16, #tpu.memory_space<vmem>>, vector<10x128xbf16>
    %c1_44 = arith.constant 1 : index
    %c0_45 = arith.constant 0 : index
    %c0_46 = arith.constant 0 : index
    %60 = vector.load %arg6[%c1_44, %c0_45, %c0_46] : memref<3x128x64xbf16, #tpu.memory_space<vmem>>, vector<1x128x64xbf16>
    %61 = vector.shape_cast %60 : vector<1x128x64xbf16> to vector<128x64xbf16>
    %cst_47 = arith.constant dense<0.000000e+00> : vector<10x64xf32>
    %62 = tpu.matmul %59, %61, %cst_47 {dimension_numbers = #tpu.dot_dimension_numbers<[1], [0], [0], [1], [0, 0, 1, 1], [], []>} : vector<10x128xbf16>, vector<128x64xbf16>, vector<10x64xf32> -> vector<10x64xf32>
    %63 = arith.addf %58, %62 : vector<10x64xf32>
    %c2_48 = arith.constant 2 : index
    %c0_49 = arith.constant 0 : index
    %64 = vector.load %arg12[%c2_48, %c0_49] : memref<12x128xbf16, #tpu.memory_space<vmem>>, vector<10x128xbf16>
    %c2_50 = arith.constant 2 : index
    %c0_51 = arith.constant 0 : index
    %c0_52 = arith.constant 0 : index
    %65 = vector.load %arg6[%c2_50, %c0_51, %c0_52] : memref<3x128x64xbf16, #tpu.memory_space<vmem>>, vector<1x128x64xbf16>
    %66 = vector.shape_cast %65 : vector<1x128x64xbf16> to vector<128x64xbf16>
    %cst_53 = arith.constant dense<0.000000e+00> : vector<10x64xf32>
    %67 = tpu.matmul %64, %66, %cst_53 {dimension_numbers = #tpu.dot_dimension_numbers<[1], [0], [0], [1], [0, 0, 1, 1], [], []>} : vector<10x128xbf16>, vector<128x64xbf16>, vector<10x64xf32> -> vector<10x64xf32>
    %68 = arith.addf %63, %67 : vector<10x64xf32>
    %69 = tpu.iota {dimensions = array<i32: 0>} : vector<10x1xi32>
    %c1_i32 = arith.constant 1 : i32
    %70 = arith.subi %0, %c1_i32 : i32
    %71 = vector.broadcast %70 : i32 to vector<10x1xi32>
    %72 = arith.addi %69, %71 : vector<10x1xi32>
    %c0_i32_54 = arith.constant 0 : i32
    %73 = vector.broadcast %c0_i32_54 : i32 to vector<10x1xi32>
    %74 = arith.cmpi sge, %72, %73 : vector<10x1xi32>
    %c16_i32_55 = arith.constant 16 : i32
    %75 = vector.broadcast %c16_i32_55 : i32 to vector<10x1xi32>
    %76 = arith.cmpi slt, %72, %75 : vector<10x1xi32>
    %77 = arith.andi %74, %76 : vector<10x1xi1>
    %cst_56 = arith.constant 0.000000e+00 : f32
    %78 = vector.shape_cast %77 : vector<10x1xi1> to vector<10x1xi1>
    %79 = vector.broadcast %78 : vector<10x1xi1> to vector<10x64xi1>
    %80 = vector.broadcast %cst_56 : f32 to vector<10x64xf32>
    %81 = arith.select %79, %68, %80 : vector<10x64xi1>, vector<10x64xf32>
    %82 = arith.truncf %81 : vector<10x64xf32> to vector<10x64xbf16>
    %c0_57 = arith.constant 0 : index
    %c0_58 = arith.constant 0 : index
    %83 = vector.load %arg13[%c0_57, %c0_58] : memref<10x64xbf16, #tpu.memory_space<vmem>>, vector<10x64xbf16>
    tpu.vector_store %arg13[%c0_57, %c0_58], %82 {strides = array<i32>} : memref<10x64xbf16, #tpu.memory_space<vmem>>, vector<10x64xbf16>,
    %cst_59 = arith.constant 0.000000e+00 : f32
    %84 = vector.broadcast %cst_59 : f32 to vector<8x128xf32>
    %c0_60 = arith.constant 0 : index
    %c0_61 = arith.constant 0 : index
    %85 = vector.load %arg13[%c0_60, %c0_61] : memref<10x64xbf16, #tpu.memory_space<vmem>>, vector<8x64xbf16>
    %c0_62 = arith.constant 0 : index
    %c0_63 = arith.constant 0 : index
    %c0_64 = arith.constant 0 : index
    %86 = vector.load %arg7[%c0_62, %c0_63, %c0_64] : memref<3x64x128xbf16, #tpu.memory_space<vmem>>, vector<1x64x128xbf16>
    %87 = vector.shape_cast %86 : vector<1x64x128xbf16> to vector<64x128xbf16>
    %cst_65 = arith.constant dense<0.000000e+00> : vector<8x128xf32>
    %88 = tpu.matmul %85, %87, %cst_65 {dimension_numbers = #tpu.dot_dimension_numbers<[1], [0], [0], [1], [0, 0, 1, 1], [], []>} : vector<8x64xbf16>, vector<64x128xbf16>, vector<8x128xf32> -> vector<8x128xf32>
    %89 = arith.addf %84, %88 : vector<8x128xf32>
    %c1_66 = arith.constant 1 : index
    %c0_67 = arith.constant 0 : index
    %90 = vector.load %arg13[%c1_66, %c0_67] : memref<10x64xbf16, #tpu.memory_space<vmem>>, vector<8x64xbf16>
    %c1_68 = arith.constant 1 : index
    %c0_69 = arith.constant 0 : index
    %c0_70 = arith.constant 0 : index
    %91 = vector.load %arg7[%c1_68, %c0_69, %c0_70] : memref<3x64x128xbf16, #tpu.memory_space<vmem>>, vector<1x64x128xbf16>
    %92 = vector.shape_cast %91 : vector<1x64x128xbf16> to vector<64x128xbf16>
    %cst_71 = arith.constant dense<0.000000e+00> : vector<8x128xf32>
    %93 = tpu.matmul %90, %92, %cst_71 {dimension_numbers = #tpu.dot_dimension_numbers<[1], [0], [0], [1], [0, 0, 1, 1], [], []>} : vector<8x64xbf16>, vector<64x128xbf16>, vector<8x128xf32> -> vector<8x128xf32>
    %94 = arith.addf %89, %93 : vector<8x128xf32>
    %c2_72 = arith.constant 2 : index
    %c0_73 = arith.constant 0 : index
    %95 = vector.load %arg13[%c2_72, %c0_73] : memref<10x64xbf16, #tpu.memory_space<vmem>>, vector<8x64xbf16>
    %c2_74 = arith.constant 2 : index
    %c0_75 = arith.constant 0 : index
    %c0_76 = arith.constant 0 : index
    %96 = vector.load %arg7[%c2_74, %c0_75, %c0_76] : memref<3x64x128xbf16, #tpu.memory_space<vmem>>, vector<1x64x128xbf16>
    %97 = vector.shape_cast %96 : vector<1x64x128xbf16> to vector<64x128xbf16>
    %cst_77 = arith.constant dense<0.000000e+00> : vector<8x128xf32>
    %98 = tpu.matmul %95, %97, %cst_77 {dimension_numbers = #tpu.dot_dimension_numbers<[1], [0], [0], [1], [0, 0, 1, 1], [], []>} : vector<8x64xbf16>, vector<64x128xbf16>, vector<8x128xf32> -> vector<8x128xf32>
    %99 = arith.addf %94, %98 : vector<8x128xf32>
    %c0_78 = arith.constant 0 : index
    %c0_79 = arith.constant 0 : index
    %100 = vector.load %arg9[%c0_78, %c0_79] : memref<2x128xf32, #tpu.memory_space<vmem>>, vector<1x128xf32>
    %101 = vector.broadcast %100 : vector<1x128xf32> to vector<8x128xf32>
    %102 = arith.mulf %99, %101 : vector<8x128xf32>
    %c1_80 = arith.constant 1 : index
    %c0_81 = arith.constant 0 : index
    %103 = vector.load %arg9[%c1_80, %c0_81] : memref<2x128xf32, #tpu.memory_space<vmem>>, vector<1x128xf32>
    %104 = vector.broadcast %103 : vector<1x128xf32> to vector<8x128xf32>
    %105 = arith.addf %102, %104 : vector<8x128xf32>
    %106 = arith.negf %105 : vector<8x128xf32>
    %107 = math.exp %106 : vector<8x128xf32>
    %cst_82 = arith.constant 1.000000e+00 : f32
    %108 = vector.broadcast %cst_82 : f32 to vector<8x128xf32>
    %109 = arith.addf %108, %107 : vector<8x128xf32>
    %110 = arith.divf %108, %109 : vector<8x128xf32>
    %111 = arith.mulf %105, %110 : vector<8x128xf32>
    %c2_83 = arith.constant 2 : index
    %c0_84 = arith.constant 0 : index
    %112 = vector.load %arg12[%c2_83, %c0_84] : memref<12x128xbf16, #tpu.memory_space<vmem>>, vector<8x128xbf16>
    %113 = arith.extf %112 : vector<8x128xbf16> to vector<8x128xf32>
    %114 = arith.addf %111, %113 : vector<8x128xf32>
    %c0_85 = arith.constant 0 : index
    %c0_86 = arith.constant 0 : index
    %c0_87 = arith.constant 0 : index
    %115 = vector.load %arg10[%c0_85, %c0_86, %c0_87] : memref<1x8x128xf32, #tpu.memory_space<vmem>>, vector<1x8x128xf32>
    %116 = vector.shape_cast %115 : vector<1x8x128xf32> to vector<8x128xf32>
    %117 = vector.shape_cast %114 : vector<8x128xf32> to vector<1x8x128xf32>
    tpu.vector_store %arg10[%c0_85, %c0_86, %c0_87], %117 {strides = array<i32>} : memref<1x8x128xf32, #tpu.memory_space<vmem>>, vector<1x8x128xf32>,
    return
  }
  func.func @transform_0(%arg0: i32, %arg1: i32) -> (i32, i32, i32) {
    %c1_i32 = arith.constant 1 : i32
    %0 = arith.addi %arg1, %c1_i32 : i32
    %c1_i32_0 = arith.constant 1 : i32
    %1 = arith.muli %0, %c1_i32_0 : i32
    %c1_i32_1 = arith.constant 1 : i32
    %2 = arith.subi %1, %c1_i32_1 : i32
    %c0_i32 = arith.constant 0 : i32
    %c0_i32_2 = arith.constant 0 : i32
    return %arg0, %2, %c0_i32 : i32, i32, i32
  }
  func.func @transform_1(%arg0: i32, %arg1: i32) -> (i32, i32, i32) {
    %c1_i32 = arith.constant 1 : i32
    %0 = arith.addi %arg1, %c1_i32 : i32
    %c0_i32 = arith.constant 0 : i32
    %c0_i32_0 = arith.constant 0 : i32
    return %arg0, %0, %c0_i32 : i32, i32, i32
  }
  func.func @transform_2(%arg0: i32, %arg1: i32) -> (i32, i32, i32) {
    %c2_i32 = arith.constant 2 : i32
    %0 = arith.addi %arg1, %c2_i32 : i32
    %c1_i32 = arith.constant 1 : i32
    %1 = arith.muli %0, %c1_i32 : i32
    %c0_i32 = arith.constant 0 : i32
    %c0_i32_0 = arith.constant 0 : i32
    return %arg0, %1, %c0_i32 : i32, i32, i32
  }
  func.func @transform_3(%arg0: i32, %arg1: i32) -> (i32, i32, i32) {
    %c0_i32 = arith.constant 0 : i32
    %c0_i32_0 = arith.constant 0 : i32
    %c0_i32_1 = arith.constant 0 : i32
    %c0_i32_2 = arith.constant 0 : i32
    return %c0_i32, %c0_i32_0, %c0_i32_1 : i32, i32, i32
  }
  func.func @transform_4(%arg0: i32, %arg1: i32) -> (i32, i32, i32) {
    %c0_i32 = arith.constant 0 : i32
    %c0_i32_0 = arith.constant 0 : i32
    %c0_i32_1 = arith.constant 0 : i32
    %c0_i32_2 = arith.constant 0 : i32
    return %c0_i32, %c0_i32_0, %c0_i32_1 : i32, i32, i32
  }
  func.func @transform_5(%arg0: i32, %arg1: i32) -> (i32, i32, i32) {
    %c0_i32 = arith.constant 0 : i32
    %c0_i32_0 = arith.constant 0 : i32
    %c0_i32_1 = arith.constant 0 : i32
    %c0_i32_2 = arith.constant 0 : i32
    return %c0_i32, %c0_i32_0, %c0_i32_1 : i32, i32, i32
  }
  func.func @transform_6(%arg0: i32, %arg1: i32) -> (i32, i32) {
    %c0_i32 = arith.constant 0 : i32
    %c0_i32_0 = arith.constant 0 : i32
    %c0_i32_1 = arith.constant 0 : i32
    return %c0_i32, %c0_i32_0 : i32, i32
  }
  func.func @transform_7(%arg0: i32, %arg1: i32) -> (i32, i32) {
    %c0_i32 = arith.constant 0 : i32
    %c0_i32_0 = arith.constant 0 : i32
    %c0_i32_1 = arith.constant 0 : i32
    return %c0_i32, %c0_i32_0 : i32, i32
  }
  func.func @transform_8(%arg0: i32, %arg1: i32) -> (i32, i32, i32) {
    %c0_i32 = arith.constant 0 : i32
    %c0_i32_0 = arith.constant 0 : i32
    return %arg0, %arg1, %c0_i32 : i32, i32, i32
  }
}

</mosaic_0001>

<bundles_post_ra>
// kernel: tile.23
= control target key start
LH: loop header
LB: loop body
LE: loop exit
PB: predicated region body
PF: predicated region fallthrough
CT: control target
= control target key end

     0   :  { %s28_s0 = inlined_call_operand.vmem [shape: f32[8], index: 0, kind: input, shape index: {}]   ;;  %s29_s1 = inlined_call_operand.vmem [shape: f32[16,8], index: 1, kind: output, shape index: {}]  }
   0x1   :  { %v4_v0 = vld [vmem:[%s28_s0] ss:$0 sm:$0xff] }
   0x2   :  { %5 = vst [vmem:[%s29_s1] sm:$0xff] %v4_v0  ;;  %8 = vst [vmem:[%s29_s1 + $0x8] sm:$0xff] %v4_v0 }

// kernel: tile.28
= control target key start
LH: loop header
LB: loop body
LE: loop exit
PB: predicated region body
PF: predicated region fallthrough
CT: control target
= control target key end

     0   :  { %s133_s10 = smov 120   ;;  %s134_s11 = smov 104   ;;  %vm3_vm0 = vcmask 64512   ;;  %vm9_vm1 = vcmask 1048512   ;;  %vm15_vm2 = vcmask 982912   ;;  %vm21_vm3 = vcmask 917312   ;;  %s209_s0 = inlined_call_operand.vmem [shape: f32[16,8], index: 0, kind: input, shape index: {}]   ;;  %s210_s1 = inlined_call_operand.vmem [shape: f32[1,128], index: 1, kind: output, shape index: {}]  }
   0x1   :  { %v103_v0 = vld [vmem:[%s209_s0 + $0xf] sm:$0x1]   ;;  %v105_v1 = vld [vmem:[%s209_s0 + $0xd] sm:$0x1]   ;;  %v104_v2 = vld [vmem:[%s209_s0 + $0xe] sm:$0x1]  }
   0x2   :  { %7 = vrot.lane.b32.xlu0 %v103_v0, %s133_s10  ;;  %19 = vrot.lane.b32.xlu1 %v105_v1, %s134_s11  ;;  %v106_v3 = vld [vmem:[%s209_s0 + $0xc] sm:$0x1]   ;;  %s135_s16 = smov 112   ;;  %s136_s17 = smov 96   ;;  %v107_v4 = vld [vmem:[%s209_s0 + $0xb] sm:$0x1]  }
   0x3   :  { %v108_v5 = vld [vmem:[%s209_s0 + $0xa] sm:$0x1]   ;;  %v2_v6 = vld [vmem:[%s209_s0] sm:$0x1]   ;;  %s137_s24 = smov 88   ;;  %s138_s25 = smov 80  }
   0x4   :  { %4 = vst.msk [vmem:[#allocation0] sm:$0x1] %vm3_vm0, %v2_v6   ;;  %v109_v7 = vld [vmem:[%s209_s0 + $0x9] sm:$0x1]   ;;  %v110_v8 = vld [vmem:[%s209_s0 + $0x8] sm:$0x1]  }
   0x5   :  { %s139_s30 = smov 72   ;;  %s140_s2 = smov 64   ;;  %v111_v9 = vld [vmem:[%s209_s0 + $0x7] sm:$0x1]   ;;  %v112_v10 = vld [vmem:[%s209_s0 + $0x6] sm:$0x1]  }
   0x6   :  { %13 = vrot.lane.b32.xlu0 %v104_v2, %s135_s16  ;;  %25 = vrot.lane.b32.xlu1 %v106_v3, %s136_s17  ;;  %s141_s7 = smov 56   ;;  %s142_s8 = smov 48   ;;  %v113_v11 = vld [vmem:[%s209_s0 + $0x5] sm:$0x1]   ;;  %v114_v12 = vld [vmem:[%s209_s0 + $0x4] sm:$0x1]  }
   0x7   :  { %s143_s13 = smov 40   ;;  %s144_s14 = smov 32   ;;  %v115_v13 = vld [vmem:[%s209_s0 + $0x3] sm:$0x1]   ;;  %v116_v14 = vld [vmem:[%s209_s0 + $0x2] sm:$0x1]  }
   0x8   :  { %s145_s19 = smov 24   ;;  %s146_s20 = smov 16   ;;  %v117_v15 = vld [vmem:[%s209_s0 + $0x1] sm:$0x1]   ;;  %vm27_vm4 = vcmask 851712   ;;  %vm33_vm5 = vcmask 786112  }
   0x9   :  { %s147_s0 = smov 8   ;;  %vm39_vm6 = vcmask 720512   ;;  %vm45_vm7 = vcmask 654912   ;;  %vm51_vm8 = vcmask 589312   ;;  %vm57_vm9 = vcmask 523712  }
   0xa   :  { %31 = vrot.lane.b32.xlu0 %v107_v4, %s137_s24  ;;  %37 = vrot.lane.b32.xlu1 %v108_v5, %s138_s25  ;;  %vm63_vm10 = vcmask 458112   ;;  %vm69_vm11 = vcmask 392512   ;;  %vm75_vm12 = vcmask 326912   ;;  %vm81_vm13 = vcmask 261312  }
   0xb   :  { %vm87_vm14 = vcmask 195712   ;;  %vm93_vm15 = vcmask 130112  }
   0xe   :  { %43 = vrot.lane.b32.xlu0 %v109_v7, %s139_s30  ;;  %49 = vrot.lane.b32.xlu1 %v110_v8, %s140_s2 }
  0x12   :  { %55 = vrot.lane.b32.xlu0 %v111_v9, %s141_s7  ;;  %61 = vrot.lane.b32.xlu1 %v112_v10, %s142_s8 }
  0x16   :  { %67 = vrot.lane.b32.xlu0 %v113_v11, %s143_s13  ;;  %73 = vrot.lane.b32.xlu1 %v114_v12, %s144_s14 }
  0x1a   :  { %79 = vrot.lane.b32.xlu0 %v115_v13, %s145_s19  ;;  %85 = vrot.lane.b32.xlu1 %v116_v14, %s146_s20 }
  0x1e   :  { %91 = vrot.lane.b32.xlu0 %v117_v15, %s147_s0 }
  0x74   :  { %v8_v16 = vpop.permute.xlu0 %7   ;;  %v20_v17 = vpop.permute.xlu1 %19  }
  0x75   :  { %10 = vst.msk [vmem:[#allocation0] sm:$0x1] %vm9_vm1, %v8_v16  }
  0x78   :  { %v14_v18 = vpop.permute.xlu0 %13   ;;  %v26_v19 = vpop.permute.xlu1 %25  }
  0x79   :  { %16 = vst.msk [vmem:[#allocation0] sm:$0x1] %vm15_vm2, %v14_v18  }
  0x7a   :  { %22 = vst.msk [vmem:[#allocation0] sm:$0x1] %vm21_vm3, %v20_v17  }
  0x7b   :  { %28 = vst.msk [vmem:[#allocation0] sm:$0x1] %vm27_vm4, %v26_v19  }
  0x7c   :  { %v32_v20 = vpop.permute.xlu0 %31   ;;  %v38_v21 = vpop.permute.xlu1 %37  }
  0x7d   :  { %34 = vst.msk [vmem:[#allocation0] sm:$0x1] %vm33_vm5, %v32_v20  }
  0x7e   :  { %40 = vst.msk [vmem:[#allocation0] sm:$0x1] %vm39_vm6, %v38_v21  }
  0x80   :  { %v44_v22 = vpop.permute.xlu0 %43   ;;  %v50_v23 = vpop.permute.xlu1 %49  }
  0x81   :  { %46 = vst.msk [vmem:[#allocation0] sm:$0x1] %vm45_vm7, %v44_v22  }
  0x82   :  { %52 = vst.msk [vmem:[#allocation0] sm:$0x1] %vm51_vm8, %v50_v23  }
  0x84   :  { %v56_v24 = vpop.permute.xlu0 %55   ;;  %v62_v25 = vpop.permute.xlu1 %61  }
  0x85   :  { %58 = vst.msk [vmem:[#allocation0] sm:$0x1] %vm57_vm9, %v56_v24  }
  0x86   :  { %64 = vst.msk [vmem:[#allocation0] sm:$0x1] %vm63_vm10, %v62_v25  }
  0x88   :  { %v68_v26 = vpop.permute.xlu0 %67   ;;  %v74_v27 = vpop.permute.xlu1 %73  }
  0x89   :  { %70 = vst.msk [vmem:[#allocation0] sm:$0x1] %vm69_vm11, %v68_v26  }
  0x8a   :  { %76 = vst.msk [vmem:[#allocation0] sm:$0x1] %vm75_vm12, %v74_v27  }
  0x8c   :  { %v80_v28 = vpop.permute.xlu0 %79   ;;  %v86_v29 = vpop.permute.xlu1 %85  }
  0x8d   :  { %82 = vst.msk [vmem:[#allocation0] sm:$0x1] %vm81_vm13, %v80_v28  }
  0x8e   :  { %88 = vst.msk [vmem:[#allocation0] sm:$0x1] %vm87_vm14, %v86_v29  }
  0x90   :  { %v92_v30 = vpop.permute.xlu0 %91  }
  0x91   :  { %94 = vst.msk [vmem:[#allocation0] sm:$0x1] %vm93_vm15, %v92_v30  }
  0x98   :  { %v99_v31 = vld [vmem:[#allocation0] sm:$0x1] }
  0x99   :  { %102 = vst [vmem:[%s210_s1] sm:$0x1] %v99_v31 }

// kernel: differential_block_forward.1
= control target key start
LH: loop header
LB: loop body
LE: loop exit
PB: predicated region body
PF: predicated region fallthrough
CT: control target
= control target key end

     0   :  { %s2100_s27 = smov 0   ;;  %s2102_s28 = smov 0   ;;  %s2437_s0 = inlined_call_operand.vmem [shape: bf16[2,32,64], index: 0, kind: input, shape index: {}, may-alias: {0,1,2}]   ;;  %s2438_s1 = inlined_call_operand.vmem [shape: bf16[2,32,64], index: 1, kind: input, shape index: {}, may-alias: {0,1,2}]   ;;  %s2439_s2 = inlined_call_operand.vmem [shape: bf16[2,32,64], index: 2, kind: input, shape index: {}, may-alias: {0,1,2}]   ;;  %s2440_s3 = inlined_call_operand.vmem [shape: bf16[3,64,128], index: 3, kind: input, shape index: {}]   ;;  %s2441_s4 = inlined_call_operand.vmem [shape: bf16[3,128,64], index: 4, kind: input, shape index: {}]   ;;  %s2442_s5 = inlined_call_operand.vmem [shape: bf16[3,64,128], index: 5, kind: input, shape index: {}]   ;;  %s2443_s6 = inlined_call_operand.vmem [shape: f32[2,128], index: 6, kind: input, shape index: {}]   ;;  %s2444_s7 = inlined_call_operand.vmem [shape: f32[2,128], index: 7, kind: input, shape index: {}]   ;;  %s2445_s8 = inlined_call_operand.vmem [shape: f32[2,16,128], index: 8, kind: output, shape index: {}]  }
   0x1   :  { %s2104_s29 = smov 0   ;;  %s2106_s30 = smov 0  }
   0x2   :  { %s2108_s9 = smov 0  }
   0x3 LB: > { %s27_s10 = sadd.s32 1, %s2043_s29  ;;  %s30_s11 = sadd.s32 1, %s2047_s30  ;;  %s2051_s9 = sphi %s2108_s9, %s18_s9   ;;  %s2047_s30 = sphi %s2106_s30, %s2452_s30   ;;  %s2043_s29 = sphi %s2104_s29, %s2451_s29   ;;  %s2039_s28 = sphi %s2102_s28, %s2450_s28   ;;  %s2035_s27 = sphi %s2100_s27, %s2449_s27  }
   0x4   : > { %p28_p0 = scmp.ge.s32.totalorder %s27_s10, 2  ;;  %p1559_p1 = scmp.ge.s32.totalorder %s2051_s9, 1 }
   0x5   : > { %p319_p2 = scmp.lt.s32.totalorder %s2051_s9, 5 }
   0x6   : > { %s2454_s10 = smov (%p28_p0, %s27_s10), 0  ;;  %s2456_s11 = smov (!%p28_p0, %s30_s11), %s2047_s30 }
   0x7   : > { %p320_p3 = pnand %p1559_p1, %p319_p2  ;;  %p32_p4 = scmp.ge.s32.totalorder %s2456_s11, 2 }
   0x8   : > { %p377_p5 = scmp.lt.s32.totalorder (!%p320_p3), %s2039_s28, 1  ;;  %p379_p6 = scmp.lt.s32.totalorder (!%p320_p3), %s2035_s27, 3 }
   0x9   : > { %s2458_s11 = smov (%p32_p4, %s2456_s11), 0  ;;  %323 = sbr.rel (%p320_p3) target bundleno = 833 (0x341), region = 52 }
   0xa   : > { %s385_s12 = sadd.s32 (!%p320_p3), 1, %s2035_s27  ;;  %s395_s17 = sadd.s32 (!%p320_p3), 2, %s2035_s27 }
   0xb   : > { %p388_p7 = scmp.lt.s32.totalorder (!%p320_p3), %s385_s12, 3  ;;  %p2184_p8 = scmp.lt.s32.totalorder (!%p320_p3), %s395_s17, 3 }
   0xc   : > { %p407_p9 = scmp.lt.s32.totalorder (!%p320_p3), %s2035_s27, 1 }
   0xe   : > { %v1945_v0 = vld [vmem:[%s2440_s3 + $0x38] sm:$0xff]   ;;  %v2053_v1 = vmov 0.0   ;;  %v1947_v3 = vld [vmem:[%s2440_s3 + $0x30] sm:$0xff]   ;;  %vm2054_vm0 = vmmov 0   ;;  %s2460_s28 = smov (!%p377_p5, %s2039_s28), 1  ;;  %v1949_v5 = vld [vmem:[%s2440_s3 + $0x28] sm:$0xff]  }
   0xf   : > { %1771 = vmatprep.subr.bf16.mxu0 %v2053_v1  ;;  %1783 = vmatprep.subr.bf16.mxu1 %v2053_v1  ;;  %v1946_v2 = vld [vmem:[%s2440_s3 + $0x18] sm:$0xff]   ;;  %v1948_v4 = vld [vmem:[%s2440_s3 + $0x10] sm:$0xff]   ;;  %s380_s20 = scalar_select %p379_p6, %s2035_s27, 3  ;;  %v1950_v6 = vld [vmem:[%s2440_s3 + $0x8] sm:$0xff]   ;;  %vm427_vm1 = vsmask.f32 1280 }
  0x10   : > { %1772 = vmatpush3.bf16.msra.mxu0 %v1945_v0  ;;  %1779 = vmatprep.mubr.msk.bf16.mxu0 %vm2054_vm0, %v2053_v1  ;;  %s2164_s23 = sshll.u32 %s2460_s28, 2  ;;  %v1951_v7 = vld [vmem:[%s2440_s3 + $0x20] sm:$0xff]   ;;  %s2462_s12 = smov (!%p388_p7, %s385_s12), 3  ;;  %vm426_vm2 = vcmask 517120   ;;  %vm445_vm3 = vsmask.f32 7942 }
  0x11   : > { %1784 = vmatpush3.bf16.msra.mxu1 %v1946_v2  ;;  %1773 = vmatprep.subr.bf16.mxu0 %v2053_v1  ;;  %s382_s26 = sadd.s32 %s2164_s23, %s380_s20  ;;  %v1952_v9 = vld [vmem:[%s2440_s3] sm:$0xff]   ;;  %s391_s24 = sadd.s32 %s2164_s23, %s2462_s12  ;;  %vm2197_vm4 = vmand %vm426_vm2, %vm427_vm1  ;;  %vm444_vm5 = vcmask 519169   ;;  %vm463_vm6 = vcmask 518145   ;;  %vm524_vm9 = vcmask 523264   ;;  %v1955_v46 = vld [vmem:[%s2440_s3 + $0x58] sm:$0xff]  }
  0x12   : > { %1785 = vmatprep.subr.bf16.mxu1 %v2053_v1  ;;  %1791 = vmatprep.mubr.msk.bf16.mxu1 %vm2054_vm0, %v2053_v1  ;;  %s1561_s13 = sshll.u32 %s382_s26, 2  ;;  %s1563_s25 = sshll.u32 %s391_s24, 2  ;;  %v429_v14 = vld [vmem:[#allocation2] sm:$0x3]  ;;  %v450_v24 = vld [vmem:[#allocation2 + $0x4] sm:$0x3]  ;;  %vm446_vm7 = vmand %vm444_vm5, %vm445_vm3 }
  0x13   : > { %s384_s16 = scalar_lea.vmem %s2437_s0, %s1561_s13  ;;  %s393_s14 = scalar_lea.vmem %s2438_s1, %s1563_s25  ;;  %vm464_vm8 = vmand %vm463_vm6, %vm445_vm3  ;;  %v1956_v48 = vld [vmem:[%s2440_s3 + $0x50] sm:$0xff]   ;;  %v1957_v49 = vld [vmem:[%s2440_s3 + $0x48] sm:$0xff]   ;;  %vm1150_vm6 = vcmask 519168  }
  0x14   : > { %1774 = vmatpush3.bf16.msra.mxu0 %v1947_v3  ;;  %v415_v8 = vld [vmem:[%s384_s16] sm:$0xc]  ;;  %s2464_s17 = smov (!%p2184_p8, %s395_s17), 3  ;;  %v1960_v54 = vld [vmem:[%s2441_s4 + $0x38] sm:$0xff]   ;;  %v1961_v55 = vld [vmem:[%s2441_s4 + $0x30] sm:$0xff]   ;;  %s1566_s21 = sshll.u32 %s2460_s28, 1 }
  0x15   : > { %1786 = vmatpush3.bf16.msra.mxu1 %v1948_v4  ;;  %1775 = vmatprep.subr.bf16.mxu0 %v2053_v1  ;;  %v417_v10 = vshrl.u32 %v415_v8, 16  ;;  %v420_v11 = vshll.u32 %v415_v8, 16  ;;  %v432_v16 = vld [vmem:[%s393_s14] sm:$0xf]  ;;  %s401_s12 = sadd.s32 %s2164_s23, %s2464_s17  ;;  %v1962_v56 = vld [vmem:[%s2441_s4 + $0x78] sm:$0xff]   ;;  %v1963_v57 = vld [vmem:[%s2441_s4 + $0x28] sm:$0xff]  }
  0x16   : > { %1787 = vmatprep.subr.bf16.mxu1 %v2053_v1  ;;  %v434_v18 = vshrl.u32 %v432_v16, 16  ;;  %v437_v19 = vshll.u32 %v432_v16, 16  ;;  %s1565_s15 = sshll.u32 %s401_s12, 2  ;;  %v1958_v52 = vld [vmem:[%s2440_s3 + $0x40] sm:$0xff]   ;;  %v1964_v58 = vld [vmem:[%s2441_s4 + $0x70] sm:$0xff]   ;;  %v1966_v60 = vld [vmem:[%s2441_s4 + $0x68] sm:$0xff]  }
  0x17   : > { %v419_v12 = vrot.slane %v417_v10, 6  ;;  %v422_v13 = vrot.slane %v420_v11, 7  ;;  %s403_s19 = scalar_lea.vmem %s2439_s2, %s1565_s15  ;;  %v1965_v59 = vld [vmem:[%s2441_s4 + $0x20] sm:$0xff]   ;;  %v1967_v61 = vld [vmem:[%s2441_s4 + $0x18] sm:$0xff]   ;;  %v1969_v63 = vld [vmem:[%s2441_s4 + $0x10] sm:$0xff]  }
  0x18   : > { %1776 = vmatpush3.bf16.msra.mxu0 %v1949_v5  ;;  %v436_v21 = vrot.slane %v434_v18, 6  ;;  %v439_v22 = vrot.slane %v437_v19, 7  ;;  %v453_v26 = vld [vmem:[%s403_s19] sm:$0x3]  ;;  %v1970_v0 = vld [vmem:[%s2441_s4 + $0x58] sm:$0xff]   ;;  %v1971_v2 = vld [vmem:[%s2441_s4 + $0x8] sm:$0xff]  }
  0x19   : > { %1788 = vmatpush3.bf16.msra.mxu1 %v1950_v6  ;;  %1777 = vmatprep.subr.bf16.mxu0 %v2053_v1  ;;  %v423_v15 = vor.u32 %v422_v13, %v419_v12  ;;  %v455_v27 = vshrl.u32 %v453_v26, 16  ;;  %v458_v28 = vshll.u32 %v453_v26, 16  ;;  %v1968_v62 = vld [vmem:[%s2441_s4 + $0x60] sm:$0xff]   ;;  %v1972_v3 = vld [vmem:[%s2441_s4 + $0x50] sm:$0xff]   ;;  %v1974_v5 = vld [vmem:[%s2441_s4 + $0x48] sm:$0xff]   ;;  %s1568_s19 = sshll.u32 %s2035_s27, 3 }
  0x1a   : > { %1789 = vmatprep.subr.bf16.mxu1 %v2053_v1  ;;  %v440_v25 = vor.u32 %v439_v22, %v436_v21  ;;  %v1973_v4 = vld [vmem:[%s2441_s4] sm:$0xff]   ;;  %s1607_s23 = sadd.s32 4294967294, %s1568_s19  ;;  %s1669_s24 = sadd.s32 4294967295, %s1568_s19 }
  0x1b   : > { %v424_v20 = vrot.slane %v423_v15, 4  ;;  %v457_v30 = vrot.slane %v455_v27, 6  ;;  %v460_v31 = vrot.slane %v458_v28, 7  ;;  %v1977_v6 = vld [vmem:[%s2441_s4 + $0x40] sm:$0xff]   ;;  %s2466_s27 = smov (!%p407_p9, %s2035_s27), 1 }
  0x1c   : > { %1778 = vmatpush3.bf16.msra.mxu0 %v1951_v7  ;;  %v441_v29 = vrot.slane %v440_v25, 4  ;;  %v1603_v17 = vld [vmem:[%s2443_s6] ss:$0 sm:$0xff]  ;;  %v1604_v19 = vld [vmem:[%s2443_s6 + $0x1] ss:$0 sm:$0xff]  ;;  %s410_s22 = sadd.s32 %s1566_s21, %s2466_s27 }
  0x1d   : > { %1790 = vmatpush3.bf16.msra.mxu1 %v1952_v9  ;;  %1795 = vmatprep.subr.bf16.mxu0 %v2053_v1  ;;  %v430_v23 = vsel %vm2197_vm4, %v424_v20, %v429_v14  ;;  %v461_v35 = vor.u32 %v460_v31, %v457_v30 }
  0x1e   : > { %1807 = vmatprep.subr.bf16.mxu1 %v2053_v1  ;;  %431 = vst [vmem:[#allocation2] sm:$0x3] %v430_v23  ;;  %v451_v32 = vsel %vm2197_vm4, %v441_v29, %v450_v24 }
  0x1f   : > { %452 = vst [vmem:[#allocation2 + $0x4] sm:$0x3] %v451_v32 }
  0x25   : > { %v447_v33 = vld [vmem:[#allocation2] sm:$0xe] }
  0x26   : > { %v448_v34 = vsel %vm446_vm7, %v440_v25, %v447_v33  ;;  %v465_v36 = vld [vmem:[#allocation2 + $0x4] sm:$0x6]  ;;  %v752_v33 = vlaneseq }
  0x27   : > { %449 = vst [vmem:[#allocation2] sm:$0xe] %v448_v34  ;;  %v466_v37 = vsel %vm464_vm8, %v461_v35, %v465_v36  ;;  %vm1152_vm8 = vcmask 516096  }
  0x28   : > { %467 = vst [vmem:[#allocation2 + $0x4] sm:$0x6] %v466_v37  ;;  %v2310_v35 = vshrl.u32 %v752_v33, 7  ;;  %v756_v37 = vstv %s1607_s23 }
  0x2e   : > { %v468_v38 = vld [vmem:[#allocation2] sm:$0xf] }
  0x2f   : > { %v478_v39 = vld [vmem:[#allocation2 + $0x4] sm:$0x7]  ;;  %v640_v50 = vld [vmem:[#allocation2] sm:$0xe] }
  0x30   : > { %v469_v40 = vld [vmem:[#allocation2 + $0x4] sm:$0x3]  ;;  %v1577_v41 = vcombine.low %v468_v38, %v478_v39  ;;  %v1597_v51 = vcombine.low %v640_v50, %v478_v39  ;;  %v2314_v39 = vadd.s32 8, %v2310_v35 }
  0x31   : > { %v1583_v42 = vcombine.low %v468_v38, %v469_v40  ;;  %v757_v38 = vadd.s32 %v756_v37, %v2310_v35 }
  0x32   : > { %v494_v43 = vshrl.u32 %v1577_v41, 16  ;;  %v496_v44 = vshll.u32 %v1577_v41, 16  ;;  %v653_v53 = vrot.slane %v1597_v51, 1  ;;  %v758_v40 = vadd.s32 %v756_v37, %v2314_v39 }
  0x33   : > { %1792 = vmatmul.mubr.msk.bf16.vlgmr.msra.gmra.mxu1 %vm524_vm9, %v1583_v42  ;;  %vm759_vm10 = vcmp.ge.s32.totalorder %v757_v38, 0  ;;  %vm761_vm11 = vcmp.lt.s32.totalorder %v757_v38, 16 }
  0x34   : > { %1823 = vmatprep.mubr.msk.bf16.mxu1 %vm2054_vm0, %v2053_v1  ;;  %v498_v45 = vrot.slane %v496_v44, 1  ;;  %1808 = vmatpush3.bf16.msra.mxu1 %v1962_v56  ;;  %vm763_vm12 = vmand %vm759_vm10, %vm761_vm11  ;;  %vm760_vm13 = vcmp.ge.s32.totalorder %v758_v40, 0  ;;  %vm762_vm14 = vcmp.lt.s32.totalorder %v758_v40, 16 }
  0x35   : > { %1809 = vmatprep.subr.bf16.mxu1 %v2053_v1  ;;  %vm764_vm15 = vmand %vm760_vm13, %vm762_vm14 }
  0x36   : > { %v499_v47 = vor.u32 %v498_v45, %v494_v43 }
  0x38   : > { %1780 = vmatmul.mubr.msk.bf16.vlgmr.msra.gmra.mxu0 %vm524_vm9, %v499_v47  ;;  %1810 = vmatpush3.bf16.msra.mxu1 %v1964_v58 }
  0x39   : > { %1796 = vmatpush3.bf16.msra.mxu0 %v1955_v46  ;;  %1803 = vmatprep.mubr.msk.bf16.mxu0 %vm2054_vm0, %v2053_v1 }
  0x3a   : > { %1797 = vmatprep.subr.bf16.mxu0 %v2053_v1  ;;  %1811 = vmatprep.subr.bf16.mxu1 %v2053_v1 }
  0x3c   : > { %1812 = vmatpush3.bf16.msra.mxu1 %v1966_v60  ;;  %v1980_v60 = vld [vmem:[%s2441_s4 + $0xa8] sm:$0xff]  }
  0x3d   : > { %1798 = vmatpush3.bf16.msra.mxu0 %v1956_v48  ;;  %1813 = vmatprep.subr.bf16.mxu1 %v2053_v1 }
  0x3e   : > { %1799 = vmatprep.subr.bf16.mxu0 %v2053_v1 }
  0x40   : > { %1814 = vmatpush3.bf16.msra.mxu1 %v1968_v62  ;;  %v1982_v62 = vld [vmem:[%s2441_s4 + $0x98] sm:$0xff]  }
  0x41   : > { %1800 = vmatpush3.bf16.msra.mxu0 %v1957_v49  ;;  %1815 = vmatprep.subr.bf16.mxu1 %v2053_v1 }
  0x42   : > { %1801 = vmatprep.subr.bf16.mxu0 %v2053_v1 }
  0x44   : > { %1816 = vmatpush3.bf16.msra.mxu1 %v1970_v0  ;;  %v1984_v0 = vld [vmem:[%s2441_s4 + $0x88] sm:$0xff]  }
  0x45   : > { %1802 = vmatpush3.bf16.msra.mxu0 %v1958_v52  ;;  %1817 = vmatprep.subr.bf16.mxu1 %v2053_v1 }
  0x46   : > { %1827 = vmatprep.subr.bf16.mxu0 %v2053_v1 }
  0x48   : > { %1804 = vmatmul.mubr.msk.bf16.vlgmr.msra.gmra.mxu0 %vm524_vm9, %v653_v53  ;;  %1818 = vmatpush3.bf16.msra.mxu1 %v1972_v3 }
  0x49   : > { %1843 = vmatprep.mubr.msk.bf16.mxu0 %vm2054_vm0, %v2053_v1  ;;  %1828 = vmatpush3.bf16.msra.mxu0 %v1960_v54 }
  0x4a   : > { %1829 = vmatprep.subr.bf16.mxu0 %v2053_v1  ;;  %1819 = vmatprep.subr.bf16.mxu1 %v2053_v1 }
  0x4c   : > { %1820 = vmatpush3.bf16.msra.mxu1 %v1974_v5 }
  0x4d   : > { %1830 = vmatpush3.bf16.msra.mxu0 %v1961_v55  ;;  %1821 = vmatprep.subr.bf16.mxu1 %v2053_v1 }
  0x4e   : > { %1831 = vmatprep.subr.bf16.mxu0 %v2053_v1 }
  0x50   : > { %1822 = vmatpush3.bf16.msra.mxu1 %v1977_v6  ;;  %v1987_v6 = vld [vmem:[%s2442_s5 + $0x58] sm:$0xff]  }
  0x51   : > { %1832 = vmatpush3.bf16.msra.mxu0 %v1963_v57  ;;  %1847 = vmatprep.subr.bf16.mxu1 %v2053_v1  ;;  %v1978_v57 = vld [vmem:[%s2441_s4 + $0xb8] sm:$0xff]  }
  0x52   : > { %1833 = vmatprep.subr.bf16.mxu0 %v2053_v1 }
  0x55   : > { %1834 = vmatpush3.bf16.msra.mxu0 %v1965_v59  ;;  %v1979_v59 = vld [vmem:[%s2441_s4 + $0xb0] sm:$0xff]  }
  0x56   : > { %1835 = vmatprep.subr.bf16.mxu0 %v2053_v1 }
  0x59   : > { %1836 = vmatpush3.bf16.msra.mxu0 %v1967_v61  ;;  %v1981_v61 = vld [vmem:[%s2441_s4 + $0xa0] sm:$0xff]  }
  0x5a   : > { %1837 = vmatprep.subr.bf16.mxu0 %v2053_v1 }
  0x5d   : > { %1838 = vmatpush3.bf16.msra.mxu0 %v1969_v63  ;;  %v1983_v63 = vld [vmem:[%s2441_s4 + $0x90] sm:$0xff]  }
  0x5e   : > { %1839 = vmatprep.subr.bf16.mxu0 %v2053_v1 }
  0x61   : > { %1840 = vmatpush3.bf16.msra.mxu0 %v1971_v2  ;;  %v1985_v2 = vld [vmem:[%s2441_s4 + $0x80] sm:$0xff]  }
  0x62   : > { %1841 = vmatprep.subr.bf16.mxu0 %v2053_v1 }
  0x65   : > { %1842 = vmatpush3.bf16.msra.mxu0 %v1973_v4 }
  0x66   : > { %1867 = vmatprep.subr.bf16.mxu0 %v2053_v1 }
  0xf3   : > { %v633_v7 = vpop.f32.mrf.mxu1 }
  0xf5   : > { %v1793_v8 = vpop.f32.mrf.mxu1 }
  0xf6   : > { %v1989_v8 = vld [vmem:[%s2442_s5 + $0x50] sm:$0xff]  }
  0xf7   : > { %v636_v9 = vpop.f32.mrf.mxu1 }
  0xf8   : > { %v562_v10 = vpop.f32.mrf.mxu0 }
  0xf9   : > { %v1794_v11 = vpop.f32.mrf.mxu1  ;;  %v634_v15 = vadd.f32 %v633_v7, %v562_v10  ;;  %v1988_v7 = vld [vmem:[%s2442_s5 + $0x38] sm:$0xff]   ;;  %v1991_v10 = vld [vmem:[%s2442_s5 + $0x48] sm:$0xff]  }
  0xfa   : > { %v1781_v12 = vpop.f32.mrf.mxu0  ;;  %v1992_v11 = vld [vmem:[%s2442_s5 + $0x28] sm:$0xff]  }
  0xfb   : > { %v1993_v12 = vld [vmem:[%s2442_s5 + $0x40] sm:$0xff]  }
  0xfc   : > { %v565_v13 = vpop.f32.mrf.mxu0 }
  0xfd   : > { %v637_v21 = vadd.f32 %v636_v9, %v565_v13  ;;  %v1990_v9 = vld [vmem:[%s2442_s5 + $0x30] sm:$0xff]   ;;  %v1994_v13 = vld [vmem:[%s2442_s5 + $0x20] sm:$0xff]  }
  0xfe   : > { %v1782_v14 = vpop.f32.mrf.mxu0 }
 0x108   : > { %v715_v16 = vpop.f32.mrf.mxu0 }
 0x109   : > { %v722_v18 = vadd.f32 %v715_v16, %v634_v15 }
 0x10a   : > { %v1805_v20 = vpop.f32.mrf.mxu0 }
 0x10b   : > { %v729_v22 = vmul.f32 %v1603_v17, %v722_v18 }
 0x10c   : > { %v718_v23 = vpop.f32.mrf.mxu0 }
 0x10d   : > { %v736_v24 = vadd.f32 %v1604_v19, %v729_v22  ;;  %v723_v25 = vadd.f32 %v718_v23, %v637_v21  ;;  %v1127_v22 = vstv %s1669_s24  ;;  %s1567_s24 = sshll.u32 %s410_s22, 3 }
 0x10e   : > { %v1806_v26 = vpop.f32.mrf.mxu0  ;;  %v1128_v23 = vadd.s32 %v1127_v22, %v2310_v35  ;;  %s412_s26 = scalar_lea.vmem %s2445_s8, %s1567_s24 }
 0x10f   : > { %v1605_v27 = vmul.f32 -1.442695, %v736_v24  ;;  %v730_v28 = vmul.f32 %v1603_v17, %v723_v25 }
 0x110   : > { %vm1130_vm1 = vcmp.ge.s32.totalorder %v1128_v23, 0  ;;  %vm1132_vm2 = vcmp.lt.s32.totalorder %v1128_v23, 16 }
 0x111   : > { %2001 = vpow2.f32 %v1605_v27  ;;  %v737_v29 = vadd.f32 %v1604_v19, %v730_v28  ;;  %vm1134_vm3 = vmand %vm1130_vm1, %vm1132_vm2 }
 0x113   : > { %v1606_v30 = vmul.f32 -1.442695, %v737_v29 }
 0x115   : > { %2003 = vpow2.f32 %v1606_v30 }
 0x11e   : > { %v2002_v31 = vpop.eup %2001 }
 0x11f   : > { %v744_v32 = vadd.f32 1.0, %v2002_v31 }
 0x121   : > { %2005 = vrcp.f32 %v744_v32 }
 0x122   : > { %v2004_v34 = vpop.eup %2003 }
 0x123   : > { %v745_v36 = vadd.f32 1.0, %v2004_v34 }
 0x125   : > { %2007 = vrcp.f32 %v745_v36 }
 0x12e   : > { %v2006_v41 = vpop.eup %2005 }
 0x12f   : > { %v750_v42 = vmul.f32 %v2006_v41, %v736_v24  ;;  %v1129_v24 = vadd.s32 %v1127_v22, %v2314_v39 }
 0x131   : > { %v769_v43 = vsel %vm763_vm12, %v750_v42, 0.0  ;;  %vm1131_vm4 = vcmp.ge.s32.totalorder %v1129_v24, 0  ;;  %vm1133_vm5 = vcmp.lt.s32.totalorder %v1129_v24, 16 }
 0x132   : > { %v2008_v44 = vpop.eup %2007  ;;  %v1710_v45 = vpack.c.bf16 %v769_v43, %v769_v43  ;;  %vm1135_vm7 = vmand %vm1131_vm4, %vm1133_vm5 }
 0x133   : > { %v751_v46 = vmul.f32 %v2008_v44, %v737_v29 }
 0x134   : > { %779 = vst [vmem:[#allocation3] sm:$0xf] %v1710_v45 }
 0x135   : > { %v770_v47 = vsel %vm764_vm15, %v751_v46, 0.0  ;;  %v1997_v46 = vld [vmem:[%s2442_s5 + $0x18] sm:$0xff]  }
 0x136   : > { %v1711_v48 = vpack.c.bf16 %v770_v47, %v770_v47 }
 0x138   : > { %780 = vst [vmem:[#allocation3 + $0x4] sm:$0x3] %v1711_v48  ;;  %v1998_v48 = vld [vmem:[%s2442_s5 + $0x10] sm:$0xff]  }
 0x13b   : > { %v781_v49 = vld [vmem:[#allocation3] sm:$0xf] }
 0x13c   : > { %v1012_v3 = vld [vmem:[#allocation3] sm:$0xe] }
 0x13f   : > { %v782_v50 = vld [vmem:[#allocation3 + $0x4] sm:$0x1] }
 0x140   : > { %v799_v51 = vld [vmem:[#allocation3 + $0x4] sm:$0x3]  ;;  %v1635_v53 = vcombine.low %v781_v49, %v782_v50  ;;  %v2000_v50 = vld [vmem:[%s2442_s5] sm:$0xff]  }
 0x141   : > { %v1626_v52 = vcombine.low %v781_v49, %v799_v51  ;;  %v1660_v4 = vcombine.low %v1012_v3, %v799_v51  ;;  %v1999_v49 = vld [vmem:[%s2442_s5 + $0x8] sm:$0xff]  }
 0x142   : > { %1844 = vmatmul.mubr.bf16.vlgmr.msra.gmra.mxu0 %v1635_v53 }
 0x143   : > { %v825_v54 = vshll.u32 %v1626_v52, 16  ;;  %1875 = vmatprep.mubr.msk.bf16.mxu0 %vm2054_vm0, %v2053_v1  ;;  %v823_v55 = vshrl.u32 %v1626_v52, 16  ;;  %v1033_v5 = vrot.slane %v1660_v4, 1  ;;  %1868 = vmatpush3.bf16.msra.mxu0 %v1988_v7 }
 0x144   : > { %1869 = vmatprep.subr.bf16.mxu0 %v2053_v1 }
 0x145   : > { %v827_v56 = vrot.slane %v825_v54, 1 }
 0x147   : > { %v828_v58 = vor.u32 %v827_v56, %v823_v55  ;;  %1870 = vmatpush3.bf16.msra.mxu0 %v1990_v9  ;;  %v1420_v9 = vld [vmem:[#allocation3] sm:$0xe] }
 0x148   : > { %1871 = vmatprep.subr.bf16.mxu0 %v2053_v1 }
 0x149   : > { %1824 = vmatmul.mubr.bf16.vlgmr.msra.gmra.mxu1 %v828_v58 }
 0x14a   : > { %1848 = vmatpush3.bf16.msra.mxu1 %v1978_v57  ;;  %1863 = vmatprep.mubr.msk.bf16.mxu1 %vm2054_vm0, %v2053_v1 }
 0x14b   : > { %1849 = vmatprep.subr.bf16.mxu1 %v2053_v1  ;;  %1872 = vmatpush3.bf16.msra.mxu0 %v1992_v11  ;;  %v1422_v11 = vunpack.c.l.bf16 %v1420_v9 }
 0x14c   : > { %1873 = vmatprep.subr.bf16.mxu0 %v2053_v1 }
 0x14e   : > { %1850 = vmatpush3.bf16.msra.mxu1 %v1979_v59 }
 0x14f   : > { %1851 = vmatprep.subr.bf16.mxu1 %v2053_v1  ;;  %1874 = vmatpush3.bf16.msra.mxu0 %v1994_v13 }
 0x150   : > { %1879 = vmatprep.subr.bf16.mxu0 %v2053_v1 }
 0x152   : > { %1852 = vmatpush3.bf16.msra.mxu1 %v1980_v60 }
 0x153   : > { %1853 = vmatprep.subr.bf16.mxu1 %v2053_v1 }
 0x156   : > { %1854 = vmatpush3.bf16.msra.mxu1 %v1981_v61  ;;  %v1705_v61 = vld [vmem:[%s2444_s7] ss:$0 sm:$0xff] }
 0x157   : > { %1855 = vmatprep.subr.bf16.mxu1 %v2053_v1 }
 0x15a   : > { %1856 = vmatpush3.bf16.msra.mxu1 %v1982_v62 }
 0x15b   : > { %1857 = vmatprep.subr.bf16.mxu1 %v2053_v1 }
 0x15e   : > { %1858 = vmatpush3.bf16.msra.mxu1 %v1983_v63  ;;  %v1706_v63 = vld [vmem:[%s2444_s7 + $0x1] ss:$0 sm:$0xff] }
 0x15f   : > { %1859 = vmatprep.subr.bf16.mxu1 %v2053_v1 }
 0x162   : > { %1860 = vmatpush3.bf16.msra.mxu1 %v1984_v0 }
 0x163   : > { %1861 = vmatprep.subr.bf16.mxu1 %v2053_v1 }
 0x166   : > { %1862 = vmatpush3.bf16.msra.mxu1 %v1985_v2 }
 0x167   : > { %1891 = vmatprep.subr.bf16.mxu1 %v2053_v1 }
 0x169   : > { %1864 = vmatmul.mubr.bf16.vlgmr.msra.gmra.mxu1 %v1033_v5 }
 0x16a   : > { %1899 = vmatprep.mubr.msk.bf16.mxu1 %vm2054_vm0, %v2053_v1  ;;  %1892 = vmatpush3.bf16.msra.mxu1 %v1987_v6 }
 0x16b   : > { %1893 = vmatprep.subr.bf16.mxu1 %v2053_v1 }
 0x16e   : > { %1894 = vmatpush3.bf16.msra.mxu1 %v1989_v8  ;;  %v1421_v8 = vld [vmem:[#allocation3 + $0x4] sm:$0x1] }
 0x16f   : > { %1895 = vmatprep.subr.bf16.mxu1 %v2053_v1 }
 0x172   : > { %1896 = vmatpush3.bf16.msra.mxu1 %v1991_v10  ;;  %v1423_v10 = vunpack.c.l.bf16 %v1421_v8 }
 0x173   : > { %1897 = vmatprep.subr.bf16.mxu1 %v2053_v1 }
 0x176   : > { %1898 = vmatpush3.bf16.msra.mxu1 %v1993_v12  ;;  %v1428_v12 = vrot.slane %v1423_v10, 2 }
 0x202   : > { %v1005_v14 = vpop.f32.mrf.mxu0 }
 0x204   : > { %v1845_v15 = vpop.f32.mrf.mxu0 }
 0x206   : > { %v1008_v16 = vpop.f32.mrf.mxu0 }
 0x208   : > { %v1846_v18 = vpop.f32.mrf.mxu0 }
 0x209   : > { %v912_v17 = vpop.f32.mrf.mxu1 }
 0x20a   : > { %v1006_v25 = vadd.f32 %v1005_v14, %v912_v17  ;;  %v1427_v14 = vrot.slane %v1422_v11, 2 }
 0x20b   : > { %v1825_v19 = vpop.f32.mrf.mxu1 }
 0x20d   : > { %v915_v20 = vpop.f32.mrf.mxu1 }
 0x20e   : > { %v1009_v29 = vadd.f32 %v1008_v16, %v915_v20 }
 0x20f   : > { %v1826_v21 = vpop.f32.mrf.mxu1 }
 0x229   : > { %v1117_v26 = vpop.f32.mrf.mxu1 }
 0x22a   : > { %v1124_v27 = vadd.f32 %v1117_v26, %v1006_v25 }
 0x22b   : > { %v1865_v28 = vpop.f32.mrf.mxu1 }
 0x22c   : > { %v1140_v30 = vsel %vm1134_vm3, %v1124_v27, 0.0 }
 0x22d   : > { %v1712_v31 = vpack.c.bf16 %v1140_v30, %v1140_v30  ;;  %v1120_v32 = vpop.f32.mrf.mxu1 }
 0x22e   : > { %v1125_v33 = vadd.f32 %v1120_v32, %v1009_v29 }
 0x22f   : > { %1151 = vst.msk [vmem:[#allocation4] sm:$0xf] %vm1150_vm6, %v1712_v31  ;;  %v1866_v34 = vpop.f32.mrf.mxu1 }
 0x230   : > { %v1141_v35 = vsel %vm1135_vm7, %v1125_v33, 0.0 }
 0x231   : > { %v1713_v36 = vpack.c.bf16 %v1141_v35, %v1141_v35 }
 0x233   : > { %1153 = vst.msk [vmem:[#allocation4 + $0x4] sm:$0x1] %vm1152_vm8, %v1713_v36 }
 0x236   : > { %v1154_v37 = vld [vmem:[#allocation4] sm:$0xf] }
 0x237   : > { %v1319_v39 = vld [vmem:[#allocation4] sm:$0xe] }
 0x23a   : > { %v1163_v38 = vld [vmem:[#allocation4 + $0x4] sm:$0x1] }
 0x23b   : > { %v1680_v40 = vcombine.low %v1154_v37, %v1163_v38  ;;  %v1699_v41 = vcombine.low %v1319_v39, %v1163_v38 }
 0x23d   : > { %v1332_v42 = vrot.slane %v1699_v41, 1  ;;  %v1181_v43 = vshll.u32 %v1680_v40, 16  ;;  %v1179_v44 = vshrl.u32 %v1680_v40, 16 }
 0x23f   : > { %1900 = vmatmul.mubr.msk.bf16.vlgmr.msra.gmra.mxu1 %vm524_vm9, %v1332_v42  ;;  %v1183_v45 = vrot.slane %v1181_v43, 1 }
 0x241   : > { %v1184_v47 = vor.u32 %v1183_v45, %v1179_v44 }
 0x243   : > { %1876 = vmatmul.mubr.msk.bf16.vlgmr.msra.gmra.mxu0 %vm524_vm9, %v1184_v47 }
 0x244   : > { %1880 = vmatpush3.bf16.msra.mxu0 %v1997_v46  ;;  %1887 = vmatprep.mubr.msk.bf16.mxu0 %vm2054_vm0, %v2053_v1  ;;  %vm1426_vm0 = vcmask 1045504  }
 0x245   : > { %1881 = vmatprep.subr.bf16.mxu0 %v2053_v1  ;;  %v1429_v16 = vsel %vm1426_vm0, %v1427_v14, %v1428_v12 }
 0x248   : > { %1882 = vmatpush3.bf16.msra.mxu0 %v1998_v48 }
 0x249   : > { %1883 = vmatprep.subr.bf16.mxu0 %v2053_v1 }
 0x24c   : > { %1884 = vmatpush3.bf16.msra.mxu0 %v1999_v49 }
 0x24d   : > { %1885 = vmatprep.subr.bf16.mxu0 %v2053_v1 }
 0x250   : > { %1886 = vmatpush3.bf16.msra.mxu0 %v2000_v50 }
 0x253   : > { %1888 = vmatmul.mubr.msk.bf16.vlgmr.msra.gmra.mxu0 %vm524_vm9, %v1154_v37 }
 0x2ff   : > { %v1394_v51 = vpop.f32.mrf.mxu1 }
 0x301   : > { %v1901_v52 = vpop.f32.mrf.mxu1 }
 0x303   : > { %v1246_v53 = vpop.f32.mrf.mxu0  ;;  %v1397_v54 = vpop.f32.mrf.mxu1 }
 0x305   : > { %v1877_v55 = vpop.f32.mrf.mxu0  ;;  %v1902_v56 = vpop.f32.mrf.mxu1 }
 0x307   : > { %v1249_v57 = vpop.f32.mrf.mxu0 }
 0x309   : > { %v1878_v58 = vpop.f32.mrf.mxu0 }
 0x313   : > { %v1313_v59 = vpop.f32.mrf.mxu0 }
 0x314   : > { %v1314_v60 = vadd.f32 %v1313_v59, %v1246_v53 }
 0x315   : > { %v1889_v1 = vpop.f32.mrf.mxu0 }
 0x316   : > { %v1400_v62 = vadd.f32 %v1394_v51, %v1314_v60 }
 0x317   : > { %v1316_v0 = vpop.f32.mrf.mxu0 }
 0x318   : > { %v1406_v2 = vmul.f32 %v1705_v61, %v1400_v62 }
 0x319   : > { %v1890_v3 = vpop.f32.mrf.mxu0 }
 0x31a   : > { %v1412_v4 = vadd.f32 %v1706_v63, %v1406_v2 }
 0x31c   : > { %v1707_v5 = vmul.f32 -1.442695, %v1412_v4 }
 0x31e   : > { %2009 = vpow2.f32 %v1707_v5 }
 0x32b   : > { %v2010_v6 = vpop.eup %2009 }
 0x32c   : > { %v1416_v7 = vadd.f32 1.0, %v2010_v6 }
 0x32e   : > { %2011 = vrcp.f32 %v1416_v7 }
 0x33b   : > { %v2012_v13 = vpop.eup %2011 }
 0x33c   : > { %v1419_v15 = vmul.f32 %v2012_v13, %v1412_v4 }
 0x33e   : > { %v1431_v17 = vadd.f32 %v1429_v16, %v1419_v15 }
 0x340   : > { %1432 = vst [vmem:[%s412_s26] sm:$0xff] %v1431_v17 }
 0x341 PF: > { %s18_s9 = sadd.s32 1, %s2051_s9   ;;  %s2449_s27 = smov %s2043_s29 }
 0x342   : > { %p15_p10 = scmp.ge.s32.totalorder %s18_s9, 6   ;;  %s2450_s28 = smov %s2047_s30 }
 0x343   : > { %s2451_s29 = smov %s2454_s10  ;;  %s2452_s30 = smov %s2458_s11 }
 0x344   :  { %17 = sbr.rel (!%p15_p10) target bundleno = 3 (0x3), region = 94 }

</bundles_post_ra>
